<compile_context>
chip_gen: v6e
topology: v6e:2x2x1
jax: 0.10.0
libtpu: 0.0.40
codegen_flags: <defaults>
</compile_context>

<pallas_src>
import jax
import jax.numpy as jnp
from jax.experimental import pallas as pl
from jax.experimental.pallas import tpu as pltpu


def _round_up(n: int, m: int) -> int:
    return ((n + m - 1) // m) * m


_TILE_CANDIDATES = (1024, 512, 256, 128)


def _select_batch_tiling(B: int):
    """Pick (batch_tile, padded_batch).

    Rank candidate tiles by: least padded-row waste (bandwidth-bound kernel),
    then >=4 grid steps (>=2 per TensorCore on v7x so double-buffering hides
    the x-tile DMA), then larger tile (amortize ~0.35us per-grid-step overhead).
    """
    B8 = _round_up(B, 8)                     # f32 sublane pack
    if B8 <= 128:
        return B8, B8                        # tiny batch: one full-batch tile
    best = None
    for tb in _TILE_CANDIDATES:
        n_tiles = -(-B8 // tb)
        B_pad = n_tiles * tb
        key = (B_pad - B8, 0 if n_tiles >= 4 else 1, -tb)
        if best is None or key < best[0]:
            best = (key, tb, B_pad)
    return best[1], best[2]


def regressor_kernel(x_ref, w1_ref, b1_ref, w2_ref, b2_ref, o_ref):
    # x_ref: (TB, D_in) tile streamed from HBM; weights/biases are VMEM-resident
    # across the whole grid (constant index_maps). All-f32: with D_in=32 / H=64 /
    # D_out=16 the kernel is HBM-bound, so f32 MXU passes are free and we keep
    # exact parity with the PyTorch float32 reference.
    h = jnp.dot(x_ref[...], w1_ref[...], preferred_element_type=jnp.float32)
    h = jnp.maximum(h + b1_ref[...], 0.0)                  # bias + ReLU on the VPU
    y = jnp.dot(h, w2_ref[...], preferred_element_type=jnp.float32)
    o_ref[...] = (y + b2_ref[...]).astype(o_ref.dtype)     # logical-width store


def regressor_forward(x, w1, b1, w2, b2):
    """Fused MLP forward: relu(x @ w1 + b1) @ w2 + b2  (weights stored (in, out))."""
    B, D_in = x.shape
    H = w1.shape[1]
    D_out = w2.shape[1]

    tb, B_p = _select_batch_tiling(B)

    # Only the batch is padded (to a multiple of the tile); padded rows are
    # sliced off below. Feature dims stay at their logical sizes.
    x_p = jnp.pad(x, ((0, B_p - B), (0, 0))) if B_p != B else x
    b1_r = b1.reshape(1, H)
    b2_r = b2.reshape(1, D_out)

    grid = (B_p // tb,)

    itemsize = 4  # f32 everywhere
    cost = pl.CostEstimate(
        flops=2 * B_p * (D_in * H + H * D_out),
        transcendentals=0,
        bytes_accessed=itemsize * (B_p * D_in + D_in * H + H
                                   + H * D_out + D_out + B_p * D_out),
    )

    out = pl.pallas_call(
        regressor_kernel,
        out_shape=jax.ShapeDtypeStruct((B_p, D_out), jnp.float32),
        grid_spec=pl.GridSpec(
            grid=grid,
            in_specs=[
                pl.BlockSpec((tb, D_in), lambda i: (i, 0)),    # streamed x tile
                pl.BlockSpec((D_in, H), lambda i: (0, 0)),     # resident w1
                pl.BlockSpec((1, H), lambda i: (0, 0)),        # resident b1
                pl.BlockSpec((H, D_out), lambda i: (0, 0)),    # resident w2
                pl.BlockSpec((1, D_out), lambda i: (0, 0)),    # resident b2
            ],
            out_specs=pl.BlockSpec((tb, D_out), lambda i: (i, 0)),
        ),
        compiler_params=pltpu.CompilerParams(
            dimension_semantics=("parallel",),   # megacore sharding on v7x
        ),
        cost_estimate=cost,
    )(x_p, w1, b1_r, w2, b2_r)

    return out[:B] if B_p != B else out


def init_params(key, input_dim, output_dim, hidden_dim=64):
    # PyTorch nn.Linear default init (U[-1/sqrt(fan_in), +1/sqrt(fan_in)]),
    # weights stored transposed ((in, out)) so the kernel computes x @ w + b.
    k1, k2, k3, k4 = jax.random.split(key, 4)
    bound1 = 1.0 / jnp.sqrt(input_dim)
    bound2 = 1.0 / jnp.sqrt(hidden_dim)
    w1 = jax.random.uniform(k1, (input_dim, hidden_dim), jnp.float32, -bound1, bound1)
    b1 = jax.random.uniform(k2, (hidden_dim,), jnp.float32, -bound1, bound1)
    w2 = jax.random.uniform(k3, (hidden_dim, output_dim), jnp.float32, -bound2, bound2)
    b2 = jax.random.uniform(k4, (output_dim,), jnp.float32, -bound2, bound2)
    return w1, b1, w2, b2


if __name__ == "__main__":
    batch = 512          # -> 4 batch tiles of 128 (>=2 pipelined steps per v7x core)
    input_dim = 32
    hidden_dim = 64
    output_dim = 16

    key = jax.random.PRNGKey(0)
    kx, kp = jax.random.split(key)
    x = jax.random.normal(kx, (batch, input_dim), jnp.float32)
    w1, b1, w2, b2 = init_params(kp, input_dim, output_dim, hidden_dim)

    fwd = jax.jit(regressor_forward)
    out = jax.block_until_ready(fwd(x, w1, b1, w2, b2))

    # Pure-JAX f32 reference (kernel is all-f32; tolerance covers MXU rounding).
    ref = jnp.maximum(x @ w1 + b1, 0.0) @ w2 + b2
    assert out.shape == (batch, output_dim)
    assert jnp.allclose(out, ref, atol=1e-2, rtol=1e-2), float(jnp.max(jnp.abs(out - ref)))

    print("KERNEL_OK")
</pallas_src>

<mosaic_0001>
module attributes {stable_mosaic.version = 11 : i64} {
  func.func @regressor_kernel(%arg0: i32, %arg1: memref<128x32xf32, #tpu.memory_space<vmem>>, %arg2: memref<32x64xf32, #tpu.memory_space<vmem>>, %arg3: memref<1x64xf32, #tpu.memory_space<vmem>>, %arg4: memref<64x16xf32, #tpu.memory_space<vmem>>, %arg5: memref<1x16xf32, #tpu.memory_space<vmem>>, %arg6: memref<128x16xf32, #tpu.memory_space<vmem>>) attributes {dimension_semantics = [#tpu.dimension_semantics<parallel>], iteration_bounds = array<i64: 4>, scalar_prefetch = 0 : i64, scratch_operands = 0 : i64, tpu.core_type = #tpu.core_type<tc>, window_params = [{transform_indices = @transform_0, window_bounds = array<i64: 128, 32>}, {pipeline_mode = #tpu.pipeline_mode<synchronous>, transform_indices = @transform_1, window_bounds = array<i64: 32, 64>}, {pipeline_mode = #tpu.pipeline_mode<synchronous>, transform_indices = @transform_2, window_bounds = array<i64: 1, 64>}, {pipeline_mode = #tpu.pipeline_mode<synchronous>, transform_indices = @transform_3, window_bounds = array<i64: 64, 16>}, {pipeline_mode = #tpu.pipeline_mode<synchronous>, transform_indices = @transform_4, window_bounds = array<i64: 1, 16>}, {transform_indices = @transform_5, window_bounds = array<i64: 128, 16>}]} {
    %c0 = arith.constant 0 : index
    %c0_0 = arith.constant 0 : index
    %0 = vector.load %arg1[%c0, %c0_0] : memref<128x32xf32, #tpu.memory_space<vmem>>, vector<128x32xf32>
    %c0_1 = arith.constant 0 : index
    %c0_2 = arith.constant 0 : index
    %1 = vector.load %arg2[%c0_1, %c0_2] : memref<32x64xf32, #tpu.memory_space<vmem>>, vector<32x64xf32>
    %cst = arith.constant dense<0.000000e+00> : vector<128x64xf32>
    %2 = tpu.matmul %0, %1, %cst {dimension_numbers = #tpu.dot_dimension_numbers<[1], [0], [0], [1], [0, 0, 1, 1], [], []>} : vector<128x32xf32>, vector<32x64xf32>, vector<128x64xf32> -> vector<128x64xf32>
    %c0_3 = arith.constant 0 : index
    %c0_4 = arith.constant 0 : index
    %3 = vector.load %arg3[%c0_3, %c0_4] : memref<1x64xf32, #tpu.memory_space<vmem>>, vector<1x64xf32>
    %4 = vector.broadcast %3 : vector<1x64xf32> to vector<128x64xf32>
    %5 = arith.addf %2, %4 : vector<128x64xf32>
    %cst_5 = arith.constant 0.000000e+00 : f32
    %6 = vector.broadcast %cst_5 : f32 to vector<128x64xf32>
    %7 = arith.maximumf %5, %6 : vector<128x64xf32>
    %c0_6 = arith.constant 0 : index
    %c0_7 = arith.constant 0 : index
    %8 = vector.load %arg4[%c0_6, %c0_7] : memref<64x16xf32, #tpu.memory_space<vmem>>, vector<64x16xf32>
    %cst_8 = arith.constant dense<0.000000e+00> : vector<128x16xf32>
    %9 = tpu.matmul %7, %8, %cst_8 {dimension_numbers = #tpu.dot_dimension_numbers<[1], [0], [0], [1], [0, 0, 1, 1], [], []>} : vector<128x64xf32>, vector<64x16xf32>, vector<128x16xf32> -> vector<128x16xf32>
    %c0_9 = arith.constant 0 : index
    %c0_10 = arith.constant 0 : index
    %10 = vector.load %arg5[%c0_9, %c0_10] : memref<1x16xf32, #tpu.memory_space<vmem>>, vector<1x16xf32>
    %11 = vector.broadcast %10 : vector<1x16xf32> to vector<128x16xf32>
    %12 = arith.addf %9, %11 : vector<128x16xf32>
    %c0_11 = arith.constant 0 : index
    %c0_12 = arith.constant 0 : index
    %13 = vector.load %arg6[%c0_11, %c0_12] : memref<128x16xf32, #tpu.memory_space<vmem>>, vector<128x16xf32>
    tpu.vector_store %arg6[%c0_11, %c0_12], %12 {strides = array<i32>} : memref<128x16xf32, #tpu.memory_space<vmem>>, vector<128x16xf32>,
    return
  }
  func.func @transform_0(%arg0: i32) -> (i32, i32) {
    %c0_i32 = arith.constant 0 : i32
    %c0_i32_0 = arith.constant 0 : i32
    return %arg0, %c0_i32 : i32, i32
  }
  func.func @transform_1(%arg0: i32) -> (i32, i32) {
    %c0_i32 = arith.constant 0 : i32
    %c0_i32_0 = arith.constant 0 : i32
    %c0_i32_1 = arith.constant 0 : i32
    return %c0_i32, %c0_i32_0 : i32, i32
  }
  func.func @transform_2(%arg0: i32) -> (i32, i32) {
    %c0_i32 = arith.constant 0 : i32
    %c0_i32_0 = arith.constant 0 : i32
    %c0_i32_1 = arith.constant 0 : i32
    return %c0_i32, %c0_i32_0 : i32, i32
  }
  func.func @transform_3(%arg0: i32) -> (i32, i32) {
    %c0_i32 = arith.constant 0 : i32
    %c0_i32_0 = arith.constant 0 : i32
    %c0_i32_1 = arith.constant 0 : i32
    return %c0_i32, %c0_i32_0 : i32, i32
  }
  func.func @transform_4(%arg0: i32) -> (i32, i32) {
    %c0_i32 = arith.constant 0 : i32
    %c0_i32_0 = arith.constant 0 : i32
    %c0_i32_1 = arith.constant 0 : i32
    return %c0_i32, %c0_i32_0 : i32, i32
  }
  func.func @transform_5(%arg0: i32) -> (i32, i32) {
    %c0_i32 = arith.constant 0 : i32
    %c0_i32_0 = arith.constant 0 : i32
    return %arg0, %c0_i32 : i32, i32
  }
}

</mosaic_0001>

<bundles_post_ra>
// kernel: regressor_forward.1
= control target key start
LH: loop header
LB: loop body
LE: loop exit
PB: predicated region body
PF: predicated region fallthrough
CT: control target
= control target key end

     0   :  { %s970_s18 = smov 0   ;;  %s1120_s0 = inlined_call_operand.vmem [shape: f32[512,32], index: 0, kind: input, shape index: {}]   ;;  %s1121_s1 = inlined_call_operand.vmem [shape: f32[32,64], index: 1, kind: input, shape index: {}]   ;;  %s1122_s2 = inlined_call_operand.vmem [shape: f32[1,64], index: 2, kind: input, shape index: {}]   ;;  %s1123_s3 = inlined_call_operand.vmem [shape: f32[64,16], index: 3, kind: input, shape index: {}]   ;;  %s1124_s4 = inlined_call_operand.vmem [shape: f32[1,16], index: 4, kind: input, shape index: {}]   ;;  %s1125_s5 = inlined_call_operand.vmem [shape: f32[512,16], index: 5, kind: output, shape index: {}]  }
   0x1 LB: > { %s747_s19 = sadd.s32 4294967295, %s938_s18   ;;  %p751_p0 = scmp.ge.s32.totalorder %s938_s18, 1  ;;  %s938_s18 = sphi %s970_s18, %s15_s18  }
   0x2   : > { %p188_p1 = scmp.lt.s32.totalorder %s938_s18, 5 }
   0x4   : > { %p189_p2 = pnand %p751_p0, %p188_p1 }
   0x5   : > { %s752_s24 = sshll.u32 (!%p189_p2), %s747_s19, 4 }
   0x6   : > { %192 = sbr.rel (%p189_p2) target bundleno = 446 (0x1be), region = 40  ;;  %p217_p3 = scmp.lt.s32.totalorder (!%p189_p2), %s752_s24, 63 }
   0xb   : > { %v247_v0 = vld [vmem:[%s1121_s1 + $0x18] sm:$0xff]  ;;  %v246_v1 = vld [vmem:[%s1121_s1 + $0x10] sm:$0xff]  ;;  %v245_v3 = vld [vmem:[%s1121_s1 + $0x8] sm:$0xff]  ;;  %s1127_s24 = smov (!%p217_p3, %s752_s24), 63  ;;  %vm255_vm0 = vcmask 261120   ;;  %vm480_vm1 = vcmask 523264  }
   0xc   : > { %836 = vmatprep.subr.mxu0 %v247_v0  ;;  %v472_v2 = vld [vmem:[%s1123_s3 + $0x38] sm:$0xff]  ;;  %v471_v4 = vld [vmem:[%s1123_s3 + $0x30] sm:$0xff]  ;;  %v244_v5 = vld [vmem:[%s1121_s1] sm:$0xff]  ;;  %s753_s8 = sshll.u32 %s1127_s24, 3  ;;  %vm674_vm2 = vcmask 130048  }
   0xd   : > { %837 = vmatpush3.msra.mxu0 %v247_v0  ;;  %908 = vmatprep.subr.mxu1 %v472_v2  ;;  %v470_v6 = vld [vmem:[%s1123_s3 + $0x28] sm:$0xff]  ;;  %s1007_s13 = scalar_lea.vmem %s1120_s0, %s753_s8  ;;  %v469_v11 = vld [vmem:[%s1123_s3 + $0x20] sm:$0xff]  ;;  %v468_v24 = vld [vmem:[%s1123_s3 + $0x18] sm:$0xff]  ;;  %s1083_s7 = scalar_lea.vmem %s1125_s5, %s753_s8 }
   0xe   : > { %838 = vmatprep.subr.mxu0 %v246_v1  ;;  %916 = vmatpush3.msra.mxu1 %v472_v2  ;;  %v228_v7 = vld [vmem:[%s1007_s13] sm:$0xff]  ;;  %v229_v8 = vld [vmem:[%s1007_s13 + $0x8] sm:$0xff]  ;;  %v230_v9 = vld [vmem:[%s1007_s13 + $0x10] sm:$0xff] }
   0xf   : > { %839 = vmatpush3.msra.mxu0 %v246_v1  ;;  %909 = vmatprep.subr.mxu1 %v471_v4  ;;  %v231_v10 = vld [vmem:[%s1007_s13 + $0x18] sm:$0xff]  ;;  %v232_v12 = vld [vmem:[%s1007_s13 + $0x20] sm:$0xff]  ;;  %v233_v13 = vld [vmem:[%s1007_s13 + $0x28] sm:$0xff] }
  0x10   : > { %840 = vmatprep.subr.mxu0 %v245_v3  ;;  %917 = vmatpush3.msra.mxu1 %v471_v4  ;;  %v234_v14 = vld [vmem:[%s1007_s13 + $0x30] sm:$0xff]  ;;  %v235_v15 = vld [vmem:[%s1007_s13 + $0x38] sm:$0xff]  ;;  %v236_v16 = vld [vmem:[%s1007_s13 + $0x40] sm:$0xff] }
  0x11   : > { %841 = vmatpush3.msra.mxu0 %v245_v3  ;;  %910 = vmatprep.subr.mxu1 %v470_v6  ;;  %v237_v17 = vld [vmem:[%s1007_s13 + $0x48] sm:$0xff]  ;;  %v238_v18 = vld [vmem:[%s1007_s13 + $0x50] sm:$0xff]  ;;  %v239_v19 = vld [vmem:[%s1007_s13 + $0x58] sm:$0xff] }
  0x12   : > { %842 = vmatprep.subr.mxu0 %v244_v5  ;;  %918 = vmatpush3.msra.mxu1 %v470_v6  ;;  %v240_v20 = vld [vmem:[%s1007_s13 + $0x60] sm:$0xff]  ;;  %v241_v21 = vld [vmem:[%s1007_s13 + $0x68] sm:$0xff]  ;;  %v242_v22 = vld [vmem:[%s1007_s13 + $0x70] sm:$0xff] }
  0x13   : > { %843 = vmatpush3.msra.mxu0 %v244_v5  ;;  %844 = vmatprep.mubr.msk.f32.mxu0 %vm255_vm0, %v228_v7  ;;  %v243_v23 = vld [vmem:[%s1007_s13 + $0x78] sm:$0xff]  ;;  %v467_v25 = vld [vmem:[%s1123_s3 + $0x10] sm:$0xff]  ;;  %v466_v26 = vld [vmem:[%s1123_s3 + $0x8] sm:$0xff] }
  0x14   : > { %845 = vmatmul.mubr.msk.f32.vlgmr.msra.gmra.mxu0 %vm255_vm0, %v229_v8  ;;  %868 = vmatprep.subr.mxu0 %v472_v2  ;;  %v465_v27 = vld [vmem:[%s1123_s3] sm:$0xff] }
  0x15   : > { %847 = vmatprep.mubr.msk.f32.mxu0 %vm255_vm0, %v230_v9  ;;  %869 = vmatpush3.msra.mxu0 %v472_v2  ;;  %v756_v28 = vld [vmem:[%s1122_s2] ss:$0 sm:$0xff] }
  0x16   : > { %870 = vmatprep.subr.mxu0 %v471_v4  ;;  %911 = vmatprep.subr.mxu1 %v469_v11 }
  0x17   : > { %871 = vmatpush3.msra.mxu0 %v471_v4  ;;  %919 = vmatpush3.msra.mxu1 %v469_v11 }
  0x18   : > { %848 = vmatmul.mubr.msk.f32.gmra.mxu0 %vm255_vm0, %v231_v10  ;;  %872 = vmatprep.subr.mxu0 %v470_v6 }
  0x19   : > { %850 = vmatprep.mubr.msk.f32.mxu0 %vm255_vm0, %v232_v12  ;;  %873 = vmatpush3.msra.mxu0 %v470_v6 }
  0x1a   : > { %874 = vmatprep.subr.mxu0 %v469_v11  ;;  %912 = vmatprep.subr.mxu1 %v468_v24 }
  0x1b   : > { %875 = vmatpush3.msra.mxu0 %v469_v11  ;;  %920 = vmatpush3.msra.mxu1 %v468_v24 }
  0x1c   : > { %851 = vmatmul.mubr.msk.f32.gmra.mxu0 %vm255_vm0, %v233_v13  ;;  %876 = vmatprep.subr.mxu0 %v468_v24  ;;  %v773_v13 = vld [vmem:[%s1124_s4] ss:$0 sm:$0xff] }
  0x1d   : > { %853 = vmatprep.mubr.msk.f32.mxu0 %vm255_vm0, %v234_v14  ;;  %877 = vmatpush3.msra.mxu0 %v468_v24 }
  0x1e   : > { %878 = vmatprep.subr.mxu0 %v467_v25  ;;  %913 = vmatprep.subr.mxu1 %v467_v25 }
  0x1f   : > { %879 = vmatpush3.msra.mxu0 %v467_v25  ;;  %921 = vmatpush3.msra.mxu1 %v467_v25 }
  0x20   : > { %854 = vmatmul.mubr.msk.f32.gmra.mxu0 %vm255_vm0, %v235_v15  ;;  %880 = vmatprep.subr.mxu0 %v466_v26 }
  0x21   : > { %856 = vmatprep.mubr.msk.f32.mxu0 %vm255_vm0, %v236_v16  ;;  %914 = vmatprep.subr.mxu1 %v466_v26 }
  0x22   : > { %881 = vmatpush3.msra.mxu0 %v466_v26  ;;  %922 = vmatpush3.msra.mxu1 %v466_v26 }
  0x23   : > { %882 = vmatprep.subr.mxu0 %v465_v27  ;;  %915 = vmatprep.subr.mxu1 %v465_v27 }
  0x24   : > { %857 = vmatmul.mubr.msk.f32.gmra.mxu0 %vm255_vm0, %v237_v17  ;;  %923 = vmatpush3.msra.mxu1 %v465_v27 }
  0x25   : > { %859 = vmatprep.mubr.msk.f32.mxu0 %vm255_vm0, %v238_v18  ;;  %883 = vmatpush3.msra.mxu0 %v465_v27 }
  0x28   : > { %860 = vmatmul.mubr.msk.f32.gmra.mxu0 %vm255_vm0, %v239_v19 }
  0x29   : > { %862 = vmatprep.mubr.msk.f32.mxu0 %vm255_vm0, %v240_v20 }
  0x2c   : > { %863 = vmatmul.mubr.msk.f32.gmra.mxu0 %vm255_vm0, %v241_v21 }
  0x2d   : > { %865 = vmatprep.mubr.msk.f32.mxu0 %vm255_vm0, %v242_v22 }
  0x30   : > { %866 = vmatmul.mubr.msk.f32.gmra.mxu0 %vm255_vm0, %v243_v23 }
  0xd4   : > { %v846_v29 = vpop.f32.mrf.mxu0 }
  0xd5   : > { %v376_v30 = vadd.f32 %v846_v29, %v756_v28 }
  0xd6   : > { %v370_v31 = vpop.f32.mrf.mxu0 }
  0xd7   : > { %v371_v32 = vadd.f32 %v756_v28, %v370_v31  ;;  %v450_v35 = vmax.f32 %v376_v30, 0.0 }
  0xd8   : > { %v849_v33 = vpop.f32.mrf.mxu0 }
  0xd9   : > { %v449_v34 = vmax.f32 %v371_v32, 0.0  ;;  %v386_v36 = vadd.f32 %v849_v33, %v756_v28 }
  0xda   : > { %v380_v37 = vpop.f32.mrf.mxu0 }
  0xdb   : > { %v381_v38 = vadd.f32 %v756_v28, %v380_v37  ;;  %884 = vmatprep.mubr.msk.f32.mxu0 %vm480_vm1, %v449_v34  ;;  %v452_v41 = vmax.f32 %v386_v36, 0.0 }
  0xdc   : > { %v852_v39 = vpop.f32.mrf.mxu0  ;;  %885 = vmatmul.mubr.msk.f32.vlgmr.msra.gmra.mxu0 %vm480_vm1, %v450_v35 }
  0xdd   : > { %v451_v40 = vmax.f32 %v381_v38, 0.0  ;;  %v396_v42 = vadd.f32 %v852_v39, %v756_v28 }
  0xde   : > { %v390_v43 = vpop.f32.mrf.mxu0 }
  0xdf   : > { %v391_v44 = vadd.f32 %v756_v28, %v390_v43  ;;  %887 = vmatprep.mubr.msk.f32.mxu1 %vm480_vm1, %v451_v40  ;;  %v454_v47 = vmax.f32 %v396_v42, 0.0 }
  0xe0   : > { %v855_v45 = vpop.f32.mrf.mxu0  ;;  %888 = vmatmul.mubr.msk.f32.vlgmr.msra.gmra.mxu1 %vm480_vm1, %v452_v41 }
  0xe1   : > { %v453_v46 = vmax.f32 %v391_v44, 0.0  ;;  %v406_v48 = vadd.f32 %v855_v45, %v756_v28 }
  0xe2   : > { %v400_v49 = vpop.f32.mrf.mxu0 }
  0xe3   : > { %v401_v50 = vadd.f32 %v756_v28, %v400_v49  ;;  %890 = vmatprep.mubr.msk.f32.mxu1 %vm480_vm1, %v453_v46  ;;  %v456_v53 = vmax.f32 %v406_v48, 0.0 }
  0xe4   : > { %v858_v51 = vpop.f32.mrf.mxu0  ;;  %891 = vmatmul.mubr.msk.f32.gmra.mxu1 %vm480_vm1, %v454_v47 }
  0xe5   : > { %v455_v52 = vmax.f32 %v401_v50, 0.0  ;;  %v416_v54 = vadd.f32 %v858_v51, %v756_v28 }
  0xe6   : > { %v410_v55 = vpop.f32.mrf.mxu0 }
  0xe7   : > { %v411_v56 = vadd.f32 %v756_v28, %v410_v55  ;;  %893 = vmatprep.mubr.msk.f32.mxu1 %vm480_vm1, %v455_v52  ;;  %v458_v59 = vmax.f32 %v416_v54, 0.0 }
  0xe8   : > { %v861_v57 = vpop.f32.mrf.mxu0  ;;  %894 = vmatmul.mubr.msk.f32.gmra.mxu1 %vm480_vm1, %v456_v53 }
  0xe9   : > { %v457_v58 = vmax.f32 %v411_v56, 0.0  ;;  %v426_v60 = vadd.f32 %v861_v57, %v756_v28 }
  0xea   : > { %v420_v61 = vpop.f32.mrf.mxu0 }
  0xeb   : > { %v421_v62 = vadd.f32 %v756_v28, %v420_v61  ;;  %896 = vmatprep.mubr.msk.f32.mxu1 %vm480_vm1, %v457_v58  ;;  %v460_v1 = vmax.f32 %v426_v60, 0.0 }
  0xec   : > { %v864_v63 = vpop.f32.mrf.mxu0  ;;  %897 = vmatmul.mubr.msk.f32.gmra.mxu1 %vm480_vm1, %v458_v59 }
  0xed   : > { %v459_v0 = vmax.f32 %v421_v62, 0.0  ;;  %v436_v2 = vadd.f32 %v864_v63, %v756_v28 }
  0xee   : > { %v430_v3 = vpop.f32.mrf.mxu0 }
  0xef   : > { %v431_v4 = vadd.f32 %v756_v28, %v430_v3  ;;  %899 = vmatprep.mubr.msk.f32.mxu1 %vm480_vm1, %v459_v0  ;;  %v462_v7 = vmax.f32 %v436_v2, 0.0 }
  0xf0   : > { %v867_v5 = vpop.f32.mrf.mxu0  ;;  %900 = vmatmul.mubr.msk.f32.gmra.mxu1 %vm480_vm1, %v460_v1 }
  0xf1   : > { %v461_v6 = vmax.f32 %v431_v4, 0.0  ;;  %v446_v8 = vadd.f32 %v867_v5, %v756_v28 }
  0xf2   : > { %v440_v9 = vpop.f32.mrf.mxu0 }
  0xf3   : > { %v441_v10 = vadd.f32 %v756_v28, %v440_v9  ;;  %902 = vmatprep.mubr.msk.f32.mxu1 %vm480_vm1, %v461_v6  ;;  %v464_v12 = vmax.f32 %v446_v8, 0.0 }
  0xf4   : > { %903 = vmatmul.mubr.msk.f32.gmra.mxu1 %vm480_vm1, %v462_v7 }
  0xf5   : > { %v463_v11 = vmax.f32 %v441_v10, 0.0 }
  0xf7   : > { %905 = vmatprep.mubr.msk.f32.mxu1 %vm480_vm1, %v463_v11 }
  0xf8   : > { %906 = vmatmul.mubr.msk.f32.gmra.mxu1 %vm480_vm1, %v464_v12 }
 0x19c   : > { %v886_v14 = vpop.f32.mrf.mxu0 }
 0x19d   : > { %v601_v15 = vadd.f32 %v886_v14, %v773_v13 }
 0x19e   : > { %v595_v16 = vpop.f32.mrf.mxu0 }
 0x19f   : > { %676 = vst.msk [vmem:[%s1083_s7 + $0x8] sm:$0xff] %vm674_vm2, %v601_v15  ;;  %v596_v17 = vadd.f32 %v773_v13, %v595_v16 }
 0x1a0   : > { %v889_v18 = vpop.f32.mrf.mxu1 }
 0x1a1   : > { %675 = vst.msk [vmem:[%s1083_s7] sm:$0xff] %vm674_vm2, %v596_v17  ;;  %v611_v19 = vadd.f32 %v889_v18, %v773_v13 }
 0x1a2   : > { %v605_v20 = vpop.f32.mrf.mxu1 }
 0x1a3   : > { %678 = vst.msk [vmem:[%s1083_s7 + $0x18] sm:$0xff] %vm674_vm2, %v611_v19  ;;  %v606_v21 = vadd.f32 %v773_v13, %v605_v20 }
 0x1a4   : > { %v892_v22 = vpop.f32.mrf.mxu1 }
 0x1a5   : > { %677 = vst.msk [vmem:[%s1083_s7 + $0x10] sm:$0xff] %vm674_vm2, %v606_v21  ;;  %v621_v23 = vadd.f32 %v892_v22, %v773_v13 }
 0x1a6   : > { %v615_v24 = vpop.f32.mrf.mxu1 }
 0x1a7   : > { %680 = vst.msk [vmem:[%s1083_s7 + $0x28] sm:$0xff] %vm674_vm2, %v621_v23  ;;  %v616_v25 = vadd.f32 %v773_v13, %v615_v24 }
 0x1a8   : > { %v895_v26 = vpop.f32.mrf.mxu1 }
 0x1a9   : > { %679 = vst.msk [vmem:[%s1083_s7 + $0x20] sm:$0xff] %vm674_vm2, %v616_v25  ;;  %v631_v27 = vadd.f32 %v895_v26, %v773_v13 }
 0x1aa   : > { %v625_v28 = vpop.f32.mrf.mxu1 }
 0x1ab   : > { %682 = vst.msk [vmem:[%s1083_s7 + $0x38] sm:$0xff] %vm674_vm2, %v631_v27  ;;  %v626_v29 = vadd.f32 %v773_v13, %v625_v28 }
 0x1ac   : > { %v898_v30 = vpop.f32.mrf.mxu1 }
 0x1ad   : > { %681 = vst.msk [vmem:[%s1083_s7 + $0x30] sm:$0xff] %vm674_vm2, %v626_v29  ;;  %v641_v31 = vadd.f32 %v898_v30, %v773_v13 }
 0x1ae   : > { %v635_v32 = vpop.f32.mrf.mxu1 }
 0x1af   : > { %684 = vst.msk [vmem:[%s1083_s7 + $0x48] sm:$0xff] %vm674_vm2, %v641_v31  ;;  %v636_v33 = vadd.f32 %v773_v13, %v635_v32 }
 0x1b0   : > { %v901_v34 = vpop.f32.mrf.mxu1 }
 0x1b1   : > { %683 = vst.msk [vmem:[%s1083_s7 + $0x40] sm:$0xff] %vm674_vm2, %v636_v33  ;;  %v651_v35 = vadd.f32 %v901_v34, %v773_v13 }
 0x1b2   : > { %v645_v36 = vpop.f32.mrf.mxu1 }
 0x1b3   : > { %686 = vst.msk [vmem:[%s1083_s7 + $0x58] sm:$0xff] %vm674_vm2, %v651_v35  ;;  %v646_v37 = vadd.f32 %v773_v13, %v645_v36 }
 0x1b4   : > { %v904_v38 = vpop.f32.mrf.mxu1 }
 0x1b5   : > { %685 = vst.msk [vmem:[%s1083_s7 + $0x50] sm:$0xff] %vm674_vm2, %v646_v37  ;;  %v661_v39 = vadd.f32 %v904_v38, %v773_v13 }
 0x1b6   : > { %v655_v40 = vpop.f32.mrf.mxu1 }
 0x1b7   : > { %688 = vst.msk [vmem:[%s1083_s7 + $0x68] sm:$0xff] %vm674_vm2, %v661_v39  ;;  %v656_v41 = vadd.f32 %v773_v13, %v655_v40 }
 0x1b8   : > { %v907_v42 = vpop.f32.mrf.mxu1 }
 0x1b9   : > { %687 = vst.msk [vmem:[%s1083_s7 + $0x60] sm:$0xff] %vm674_vm2, %v656_v41  ;;  %v671_v43 = vadd.f32 %v907_v42, %v773_v13 }
 0x1ba   : > { %v665_v44 = vpop.f32.mrf.mxu1 }
 0x1bb   : > { %690 = vst.msk [vmem:[%s1083_s7 + $0x78] sm:$0xff] %vm674_vm2, %v671_v43  ;;  %v666_v45 = vadd.f32 %v773_v13, %v665_v44 }
 0x1bd   : > { %689 = vst.msk [vmem:[%s1083_s7 + $0x70] sm:$0xff] %vm674_vm2, %v666_v45 }
 0x1be PF: > { %s15_s18 = sadd.s32 1, %s938_s18  }
 0x1bf   : > { %p12_p4 = scmp.ge.s32.totalorder %s15_s18, 6  }
 0x1c1   :  { %14 = sbr.rel (!%p12_p4) target bundleno = 1 (0x1), region = 70 }

</bundles_post_ra>
